<compile_context>
chip_gen: v7x
topology: tpu7x:2x2x1
jax: 0.10.0
libtpu: 0.0.40
codegen_flags: <defaults>
</compile_context>

<pallas_src>
import functools

import jax
import jax.numpy as jnp
from jax.experimental import pallas as pl
from jax.experimental.pallas import tpu as pltpu


def _round_up(x, m):
    return (x + m - 1) // m * m


_BIG = 2 ** 30          # padded-target sentinel
_BIG_E = 2 ** 30 + 1    # padded-edge sentinel (keeps dst array sorted)


# ----------------------------------------------------------------------------
# Pallas kernels (flipped orientation: lane dimension = target tile)
# ----------------------------------------------------------------------------
def _neighbor_kernel(fb_ref, nb_ref, tgt_ref, dst_ref, x_ref, inv_ref,
                     o_ref, acc_ref):
    """acc[:, t] = sum_{e: dst(e)=tgt(t)} x[:, e];  out = acc * (1/deg)."""
    i = pl.program_id(0)
    k = pl.program_id(1)

    @pl.when(k == 0)
    def _():
        acc_ref[...] = jnp.zeros_like(acc_ref)

    # Only the edge blocks that can actually contain this target tile's edges.
    @pl.when(k < nb_ref[i])
    def _():
        # mask[e, t] = 1 iff edge e points at target t   (exact in bf16)
        mask = (dst_ref[...] == tgt_ref[...]).astype(x_ref.dtype)       # (Te, Tt)
        acc_ref[...] += jnp.dot(x_ref[...], mask,
                                preferred_element_type=jnp.float32)     # (D, Tt)

    @pl.when(k == pl.num_programs(1) - 1)
    def _():
        o_ref[...] = acc_ref[...] * inv_ref[...]                        # (D, Tt)


def _neighbor_linear_kernel(fb_ref, nb_ref, tgt_ref, dst_ref, x_ref, inv_ref,
                            w_ref, b_ref, o_ref, acc_ref):
    """out = W @ mean + b (bias gated by deg>0), in the flipped layout."""
    i = pl.program_id(0)
    k = pl.program_id(1)

    @pl.when(k == 0)
    def _():
        acc_ref[...] = jnp.zeros_like(acc_ref)

    @pl.when(k < nb_ref[i])
    def _():
        mask = (dst_ref[...] == tgt_ref[...]).astype(x_ref.dtype)       # (Te, Tt)
        acc_ref[...] += jnp.dot(x_ref[...], mask,
                                preferred_element_type=jnp.float32)     # (D, Tt)

    @pl.when(k == pl.num_programs(1) - 1)
    def _():
        inv = inv_ref[...]                                              # (1, Tt)
        mean = (acc_ref[...] * inv).astype(jnp.bfloat16)                # (D, Tt)
        proj = jnp.dot(w_ref[...], mean,
                       preferred_element_type=jnp.float32)              # (HD, Tt)
        gate = (inv > 0.0).astype(jnp.float32)                          # (1, Tt)
        o_ref[...] = proj + b_ref[...] * gate


# ----------------------------------------------------------------------------
# Wrapper (plain-JAX glue: sort, embedding gather, degree, pallas_call plumbing)
# ----------------------------------------------------------------------------
def meta_metapath_forward(features, edge_metapath_indices, edge_dst, target_idx,
                          agg_weight, agg_bias, *, num_heads, hidden_dim,
                          agg_type="neighbor", tile_t=512, tile_e=4096):
    E = edge_metapath_indices.shape[0]
    T = target_idx.shape[0]
    D = hidden_dim
    HD = num_heads * hidden_dim

    edge_dst = edge_dst.astype(jnp.int32)
    target_idx = target_idx.astype(jnp.int32)

    # --- sort edges by destination node id so every target tile touches a
    #     contiguous range of edge blocks (enables tile skipping) -------------
    edge_perm = jnp.argsort(edge_dst)
    dst_sorted = edge_dst[edge_perm]
    idx0_sorted = edge_metapath_indices[edge_perm, 0]

    # --- sort targets so each target tile spans a contiguous node-id range ---
    tgt_perm = jnp.argsort(target_idx)
    tgt_sorted = target_idx[tgt_perm]
    inv_tgt_perm = jnp.argsort(tgt_perm)   # out_original = out_sorted[inv_tgt_perm]

    # tile sizes: lane-friendly (multiples of 128), clamped to the padded problem
    Tt = min(_round_up(tile_t, 128), _round_up(T, 128))
    Te = min(_round_up(tile_e, 128), _round_up(E, 128))
    T_pad = _round_up(T, Tt)
    E_pad = _round_up(E, Te)
    n_t_blocks = T_pad // Tt
    n_e_blocks = E_pad // Te

    # --- gather once, in bf16, directly into the padded transposed layout ----
    # TODO(synk): data-dependent row gather is left to XLA; a BlockSpec cannot
    # express it without per-edge scalar prefetch.
    idx0_p = jnp.pad(idx0_sorted, (0, E_pad - E))             # pad with a valid id
    x_p = jnp.take(features.astype(jnp.bfloat16).T, idx0_p, axis=1)   # (D, E_pad)

    # padded ids can never match anything real (ids assumed < 2**30)
    dst_p = jnp.pad(dst_sorted, (0, E_pad - E), constant_values=_BIG_E)
    tgt_p = jnp.pad(tgt_sorted, (0, T_pad - T), constant_values=_BIG)

    # --- per-target-tile edge block range (scalar prefetch table) ------------
    ts = tgt_p.reshape(n_t_blocks, Tt)
    tile_min = ts[:, 0]                                        # sorted ascending
    tile_max = jnp.max(jnp.where(ts < _BIG, ts, -1), axis=1)   # ignore pad rows
    lo = jnp.searchsorted(dst_p, tile_min, side="left")
    hi = jnp.searchsorted(dst_p, tile_max, side="right")
    first_block = (lo // Te).astype(jnp.int32)
    last_block = (-(-hi // Te)).astype(jnp.int32)              # ceil div
    num_blocks = jnp.maximum(last_block - first_block, 0).astype(jnp.int32)

    # exact in-degree (== edge_softmax(ones) denominator) per sorted target
    deg = (jnp.searchsorted(dst_p, tgt_p, side="right")
           - jnp.searchsorted(dst_p, tgt_p, side="left")).astype(jnp.float32)
    inv_deg = jnp.where(deg > 0.0, 1.0 / deg, 0.0).reshape(1, T_pad)

    # grid K axis = max edge blocks any tile needs (host sync; pass a static
    # bound such as n_e_blocks instead if this wrapper is jitted).
    K = max(int(jnp.max(num_blocks)), 1)

    tgt_2d = tgt_p.reshape(1, T_pad)
    dst_2d = dst_p.reshape(E_pad, 1)

    def _e_block(i, k, fb, nb):
        return jnp.minimum(fb[i] + k, n_e_blocks - 1)

    tgt_spec = pl.BlockSpec((1, Tt), lambda i, k, fb, nb: (0, i))
    dst_spec = pl.BlockSpec((Te, 1), lambda i, k, fb, nb: (_e_block(i, k, fb, nb), 0))
    x_spec = pl.BlockSpec((D, Te), lambda i, k, fb, nb: (0, _e_block(i, k, fb, nb)))
    inv_spec = pl.BlockSpec((1, Tt), lambda i, k, fb, nb: (0, i))

    scratch_shapes = [pltpu.VMEM((D, Tt), jnp.float32)]
    # NOTE(v7x): for small T (single target tile) only one TensorCore gets work;
    # shrink Tt or split the edge axis across cores if that matters.
    compiler_params = pltpu.CompilerParams(
        dimension_semantics=("parallel", "arbitrary"),
        vmem_limit_bytes=32 * 1024 * 1024)

    if agg_type == "neighbor":
        out = pl.pallas_call(
            _neighbor_kernel,
            out_shape=jax.ShapeDtypeStruct((D, T_pad), jnp.float32),
            grid_spec=pltpu.PrefetchScalarGridSpec(
                num_scalar_prefetch=2,
                grid=(n_t_blocks, K),
                in_specs=[tgt_spec, dst_spec, x_spec, inv_spec],
                out_specs=pl.BlockSpec((D, Tt), lambda i, k, fb, nb: (0, i)),
                scratch_shapes=scratch_shapes),
            compiler_params=compiler_params,
        )(first_block, num_blocks, tgt_2d, dst_2d, x_p, inv_deg)
        out_td = jnp.take(out, inv_tgt_perm, axis=1).T                 # (T, D)
        # cat([hidden]*H, dim=1).view(T, H, D): every head sees the same vector
        return jnp.broadcast_to(out_td[:, None, :], (T, num_heads, D))

    elif agg_type == "neighbor-linear":
        # nn.Linear: y = x @ W^T + b ;  flipped layout: y^T = W @ x^T + b
        w_bf = agg_weight.astype(jnp.bfloat16)                         # (HD, D)
        b2d = agg_bias.astype(jnp.float32).reshape(HD, 1)              # (HD, 1)
        w_spec = pl.BlockSpec((HD, D), lambda i, k, fb, nb: (0, 0))
        b_spec = pl.BlockSpec((HD, 1), lambda i, k, fb, nb: (0, 0))
        out = pl.pallas_call(
            _neighbor_linear_kernel,
            out_shape=jax.ShapeDtypeStruct((HD, T_pad), jnp.float32),
            grid_spec=pltpu.PrefetchScalarGridSpec(
                num_scalar_prefetch=2,
                grid=(n_t_blocks, K),
                in_specs=[tgt_spec, dst_spec, x_spec, inv_spec, w_spec, b_spec],
                out_specs=pl.BlockSpec((HD, Tt), lambda i, k, fb, nb: (0, i)),
                scratch_shapes=scratch_shapes),
            compiler_params=compiler_params,
        )(first_block, num_blocks, tgt_2d, dst_2d, x_p, inv_deg, w_bf, b2d)
        out_thd = jnp.take(out, inv_tgt_perm, axis=1).T                # (T, HD)
        return out_thd.reshape(T, num_heads, D)

    raise ValueError(f"unknown agg_type {agg_type!r}")


# ----------------------------------------------------------------------------
# Pure-JAX reference (mirrors the PyTorch/DGL semantics) for verification
# ----------------------------------------------------------------------------
def meta_metapath_reference(features, edge_metapath_indices, edge_dst, target_idx,
                            agg_weight, agg_bias, *, num_heads, hidden_dim,
                            num_nodes, agg_type="neighbor"):
    E = edge_metapath_indices.shape[0]
    x0 = features[edge_metapath_indices[:, 0]].astype(jnp.float32)    # (E, D)
    if agg_type == "neighbor":
        hidden = jnp.concatenate([x0] * num_heads, axis=1)            # (E, H*D)
    else:
        hidden = x0 @ agg_weight.T + agg_bias                         # (E, H*D)
    eft = hidden.reshape(E, num_heads, hidden_dim)
    deg = jnp.zeros((num_nodes,), jnp.float32).at[edge_dst].add(1.0)
    c_new = 1.0 / jnp.maximum(deg[edge_dst], 1.0)                     # edge_softmax(ones)
    m = eft * c_new[:, None, None]
    ft = jnp.zeros((num_nodes, num_heads, hidden_dim), jnp.float32).at[edge_dst].add(m)
    return ft[target_idx]


# ----------------------------------------------------------------------------
if __name__ == "__main__":
    # Small, deterministic problem
    NUM_NODES = 16     # graph nodes
    HIDDEN = 32        # hidden_dim
    HEADS = 4          # num_heads
    E = 64             # number of edges
    L = 3              # metapath length
    T = 8              # number of target nodes

    key = jax.random.PRNGKey(0)
    k1, k2, k3, k4, k5 = jax.random.split(key, 5)

    features = jax.random.normal(k1, (NUM_NODES, HIDDEN), dtype=jnp.float32)
    edge_metapath_indices = jax.random.randint(k2, (E, L), 0, NUM_NODES, dtype=jnp.int32)
    # edges never point at node 15 -> target 15 has zero in-degree (tests the gate)
    edge_dst = jax.random.randint(k3, (E,), 0, NUM_NODES - 1, dtype=jnp.int32)
    # unsorted targets, with a duplicate (node 3) and a zero-in-degree node (15)
    target_idx = jnp.array([0, 3, 5, 15, 7, 3, 9, 11], dtype=jnp.int32)

    # nn.Linear(hidden_dim, num_heads*hidden_dim) parameters (deterministic init)
    agg_weight = 0.05 * jax.random.normal(k4, (HEADS * HIDDEN, HIDDEN), dtype=jnp.float32)
    agg_bias = 0.05 * jax.random.normal(k5, (HEADS * HIDDEN,), dtype=jnp.float32)

    ok = True
    for agg_type in ("neighbor", "neighbor-linear"):
        out = meta_metapath_forward(
            features, edge_metapath_indices, edge_dst, target_idx,
            agg_weight, agg_bias,
            num_heads=HEADS, hidden_dim=HIDDEN, agg_type=agg_type)
        out = jax.block_until_ready(out)

        ref = meta_metapath_reference(
            features, edge_metapath_indices, edge_dst, target_idx,
            agg_weight, agg_bias,
            num_heads=HEADS, hidden_dim=HIDDEN, num_nodes=NUM_NODES,
            agg_type=agg_type)

        if out.shape != (T, HEADS, HIDDEN):
            ok = False
        # bf16 MXU inputs (f32 accumulate) -> loosened tolerance vs f32 reference
        if not jnp.allclose(out, ref, atol=2e-2, rtol=2e-2):
            ok = False

    if ok:
        print("KERNEL_OK")
    else:
        print("KERNEL_MISMATCH")
</pallas_src>

<mosaic_0001>
module attributes {stable_mosaic.version = 11 : i64} {
  func.func @_neighbor_kernel(%arg0: i32, %arg1: i32, %arg2: memref<1xi32, #tpu.memory_space<smem>>, %arg3: memref<1xi32, #tpu.memory_space<smem>>, %arg4: memref<1x128xi32, #tpu.memory_space<vmem>>, %arg5: memref<128x1xi32, #tpu.memory_space<vmem>>, %arg6: memref<32x128xbf16, #tpu.memory_space<vmem>>, %arg7: memref<1x128xf32, #tpu.memory_space<vmem>>, %arg8: memref<32x128xf32, #tpu.memory_space<vmem>>, %arg9: memref<32x128xf32, #tpu.memory_space<vmem>>) attributes {dimension_semantics = [#tpu.dimension_semantics<parallel>, #tpu.dimension_semantics<arbitrary>], iteration_bounds = array<i64: 1, 1>, scalar_prefetch = 2 : i64, scratch_operands = 1 : i64, tpu.core_type = #tpu.core_type<tc>, window_params = [{transform_indices = @transform_0, window_bounds = array<i64: 1, 128>}, {transform_indices = @transform_1, window_bounds = array<i64: 128, 1>}, {transform_indices = @transform_2, window_bounds = array<i64: 32, 128>}, {transform_indices = @transform_3, window_bounds = array<i64: 1, 128>}, {transform_indices = @transform_4, window_bounds = array<i64: 32, 128>}]} {
    %c0_i32 = arith.constant 0 : i32
    %0 = arith.cmpi eq, %arg1, %c0_i32 : i32
    %1 = arith.extui %0 : i1 to i32
    %c0_i32_0 = arith.constant 0 : i32
    %2 = arith.cmpi ne, %1, %c0_i32_0 : i32
    scf.if %2 {
      %cst = arith.constant 0.000000e+00 : f32
      %11 = vector.broadcast %cst : f32 to vector<32x128xf32>
      %c0 = arith.constant 0 : index
      %c0_4 = arith.constant 0 : index
      %12 = vector.load %arg9[%c0, %c0_4] : memref<32x128xf32, #tpu.memory_space<vmem>>, vector<32x128xf32>
      tpu.vector_store %arg9[%c0, %c0_4], %11 {strides = array<i32>} : memref<32x128xf32, #tpu.memory_space<vmem>>, vector<32x128xf32>,
    } else {
    }
    %3 = arith.index_cast %arg0 : i32 to index
    %4 = memref.load %arg3[%3] : memref<1xi32, #tpu.memory_space<smem>>
    %5 = arith.cmpi slt, %arg1, %4 : i32
    %6 = arith.extui %5 : i1 to i32
    %c0_i32_1 = arith.constant 0 : i32
    %7 = arith.cmpi ne, %6, %c0_i32_1 : i32
    scf.if %7 {
      %c0 = arith.constant 0 : index
      %c0_4 = arith.constant 0 : index
      %11 = vector.load %arg5[%c0, %c0_4] : memref<128x1xi32, #tpu.memory_space<vmem>>, vector<128x1xi32>
      %c0_5 = arith.constant 0 : index
      %c0_6 = arith.constant 0 : index
      %12 = vector.load %arg4[%c0_5, %c0_6] : memref<1x128xi32, #tpu.memory_space<vmem>>, vector<1x128xi32>
      %13 = vector.broadcast %11 : vector<128x1xi32> to vector<128x128xi32>
      %14 = vector.broadcast %12 : vector<1x128xi32> to vector<128x128xi32>
      %15 = arith.cmpi eq, %13, %14 : vector<128x128xi32>
      %16 = arith.extui %15 : vector<128x128xi1> to vector<128x128xi32>
      %17 = arith.sitofp %16 : vector<128x128xi32> to vector<128x128xf32>
      %18 = arith.truncf %17 : vector<128x128xf32> to vector<128x128xbf16>
      %c0_7 = arith.constant 0 : index
      %c0_8 = arith.constant 0 : index
      %19 = vector.load %arg9[%c0_7, %c0_8] : memref<32x128xf32, #tpu.memory_space<vmem>>, vector<32x128xf32>
      %c0_9 = arith.constant 0 : index
      %c0_10 = arith.constant 0 : index
      %20 = vector.load %arg6[%c0_9, %c0_10] : memref<32x128xbf16, #tpu.memory_space<vmem>>, vector<32x128xbf16>
      %cst = arith.constant dense<0.000000e+00> : vector<32x128xf32>
      %21 = tpu.matmul %20, %18, %cst {dimension_numbers = #tpu.dot_dimension_numbers<[1], [0], [0], [1], [0, 0, 1, 1], [], []>} : vector<32x128xbf16>, vector<128x128xbf16>, vector<32x128xf32> -> vector<32x128xf32>
      %22 = arith.addf %19, %21 : vector<32x128xf32>
      %c0_11 = arith.constant 0 : index
      %c0_12 = arith.constant 0 : index
      %23 = vector.load %arg9[%c0_11, %c0_12] : memref<32x128xf32, #tpu.memory_space<vmem>>, vector<32x128xf32>
      tpu.vector_store %arg9[%c0_11, %c0_12], %22 {strides = array<i32>} : memref<32x128xf32, #tpu.memory_space<vmem>>, vector<32x128xf32>,
    } else {
    }
    %c0_i32_2 = arith.constant 0 : i32
    %8 = arith.cmpi eq, %arg1, %c0_i32_2 : i32
    %9 = arith.extui %8 : i1 to i32
    %c0_i32_3 = arith.constant 0 : i32
    %10 = arith.cmpi ne, %9, %c0_i32_3 : i32
    scf.if %10 {
      %c0 = arith.constant 0 : index
      %c0_4 = arith.constant 0 : index
      %11 = vector.load %arg9[%c0, %c0_4] : memref<32x128xf32, #tpu.memory_space<vmem>>, vector<32x128xf32>
      %c0_5 = arith.constant 0 : index
      %c0_6 = arith.constant 0 : index
      %12 = vector.load %arg7[%c0_5, %c0_6] : memref<1x128xf32, #tpu.memory_space<vmem>>, vector<1x128xf32>
      %13 = vector.broadcast %12 : vector<1x128xf32> to vector<32x128xf32>
      %14 = arith.mulf %11, %13 : vector<32x128xf32>
      %c0_7 = arith.constant 0 : index
      %c0_8 = arith.constant 0 : index
      %15 = vector.load %arg8[%c0_7, %c0_8] : memref<32x128xf32, #tpu.memory_space<vmem>>, vector<32x128xf32>
      tpu.vector_store %arg8[%c0_7, %c0_8], %14 {strides = array<i32>} : memref<32x128xf32, #tpu.memory_space<vmem>>, vector<32x128xf32>,
    } else {
    }
    return
  }
  func.func @transform_0(%arg0: i32, %arg1: i32, %arg2: memref<1xi32, #tpu.memory_space<smem>>, %arg3: memref<1xi32, #tpu.memory_space<smem>>) -> (i32, i32) {
    %c0_i32 = arith.constant 0 : i32
    %c0_i32_0 = arith.constant 0 : i32
    return %c0_i32, %arg0 : i32, i32
  }
  func.func @transform_1(%arg0: i32, %arg1: i32, %arg2: memref<1xi32, #tpu.memory_space<smem>>, %arg3: memref<1xi32, #tpu.memory_space<smem>>) -> (i32, i32) {
    %0 = arith.index_cast %arg0 : i32 to index
    %1 = memref.load %arg2[%0] : memref<1xi32, #tpu.memory_space<smem>>
    %2 = arith.addi %1, %arg1 : i32
    %c0_i32 = arith.constant 0 : i32
    %3 = arith.minsi %2, %c0_i32 : i32
    %c0_i32_0 = arith.constant 0 : i32
    %c0_i32_1 = arith.constant 0 : i32
    return %3, %c0_i32_0 : i32, i32
  }
  func.func @transform_2(%arg0: i32, %arg1: i32, %arg2: memref<1xi32, #tpu.memory_space<smem>>, %arg3: memref<1xi32, #tpu.memory_space<smem>>) -> (i32, i32) {
    %0 = arith.index_cast %arg0 : i32 to index
    %1 = memref.load %arg2[%0] : memref<1xi32, #tpu.memory_space<smem>>
    %2 = arith.addi %1, %arg1 : i32
    %c0_i32 = arith.constant 0 : i32
    %3 = arith.minsi %2, %c0_i32 : i32
    %c0_i32_0 = arith.constant 0 : i32
    %c0_i32_1 = arith.constant 0 : i32
    return %c0_i32_0, %3 : i32, i32
  }
  func.func @transform_3(%arg0: i32, %arg1: i32, %arg2: memref<1xi32, #tpu.memory_space<smem>>, %arg3: memref<1xi32, #tpu.memory_space<smem>>) -> (i32, i32) {
    %c0_i32 = arith.constant 0 : i32
    %c0_i32_0 = arith.constant 0 : i32
    return %c0_i32, %arg0 : i32, i32
  }
  func.func @transform_4(%arg0: i32, %arg1: i32, %arg2: memref<1xi32, #tpu.memory_space<smem>>, %arg3: memref<1xi32, #tpu.memory_space<smem>>) -> (i32, i32) {
    %c0_i32 = arith.constant 0 : i32
    %c0_i32_0 = arith.constant 0 : i32
    return %c0_i32, %arg0 : i32, i32
  }
}

</mosaic_0001>

<bundles_post_ra>
// kernel: tpu_custom_call.1
= control target key start
LH: loop header
LB: loop body
LE: loop exit
PB: predicated region body
PF: predicated region fallthrough
CT: control target
= control target key end

     0   :  { %13 = vsyncpa [#allocation7], 0  ;;  %v465_v0 = vmov 0.0   ;;  %s561_s0 = inlined_call_operand.<no memory space> [shape: s32[1], index: 0, kind: input, shape index: {}]   ;;  %s562_s1 = inlined_call_operand.<no memory space> [shape: s32[1], index: 1, kind: input, shape index: {}]   ;;  %s563_s2 = inlined_call_operand.vmem [shape: s32[1,128], index: 2, kind: input, shape index: {}]   ;;  %s564_s3 = inlined_call_operand.vmem [shape: s32[128,1], index: 3, kind: input, shape index: {}]   ;;  %s565_s4 = inlined_call_operand.vmem [shape: bf16[32,128], index: 4, kind: input, shape index: {}]   ;;  %s566_s5 = inlined_call_operand.vmem [shape: f32[1,128], index: 5, kind: input, shape index: {}]   ;;  %s567_s6 = inlined_call_operand.hbm [shape: f32[32,128], index: 6, kind: output, shape index: {}]  }
   0x1   :  { %p67_p0 = scmp.lt.s32.totalorder %s561_s0, 0  ;;  %96 = vst [vmem:[#allocation2] sm:$0xff] %v465_v0  ;;  %97 = vst [vmem:[#allocation2 + $0x8] sm:$0xff] %v465_v0  ;;  %p364_p2 = scmp.le.s32.totalorder %s562_s1, 0 }
   0x2   :  { %98 = vst [vmem:[#allocation2 + $0x10] sm:$0xff] %v465_v0  ;;  %99 = vst [vmem:[#allocation2 + $0x18] sm:$0xff] %v465_v0  ;;  %v466_v3 = vmov (!%p364_p2), 0   ;;  %v365_v21 = vld [vmem:[%s563_s2] ss:$0 sm:$0xff] (!%p364_p2) }
   0x3   :  { %s569_s0 = smov (!%p67_p0, %s561_s0), 0  ;;  %104 = sbr.rel (%p364_p2) target bundleno = 395 (0x18b), region = 25 }
   0x4   :  { %s357_s25 = sshll.u32 %s569_s0, 4  ;;  %s571_s0 = smov (!%p67_p0, %s569_s0), 0  ;;  %438 = vset.pattern.permute.xlu1 (!%p364_p2), %v466_v3  ;;  %437 = vset.pattern.permute.xlu0 (!%p364_p2), %v466_v3  ;;  %v467_v24 = vmov (!%p364_p2), 1.0|1.0  }
   0x5   :  { %p70_p1 = scmp.lt.s32.totalorder %s357_s25, 15  ;;  %s362_s26 = sshll.u32 %s571_s0, 2 }
   0x6   :  { %s515_s30 = scalar_lea.vmem %s565_s4, %s362_s26 }
   0x7   :  { %s573_s25 = smov (!%p70_p1, %s357_s25), 15  ;;  %v439_v18 = vld [vmem:[%s515_s30] sm:$0xff] (!%p364_p2)   ;;  %v440_v37 = vld [vmem:[%s515_s30 + $0x8] sm:$0xff] (!%p364_p2)  }
   0x8   :  { %s358_s27 = sshll.u32 %s573_s25, 3  ;;  %427 = vmatprep.mubr.bf16.mxu0 (!%p364_p2), %v439_v18  ;;  %v230_v39 = vld [vmem:[#allocation2] sm:$0xff] (!%p364_p2)  ;;  %v231_v44 = vld [vmem:[#allocation2 + $0x8] sm:$0xff] (!%p364_p2) }
   0x9   :  { %s520_s9 = scalar_lea.vmem %s564_s3, %s358_s27  ;;  %v232_v38 = vld [vmem:[#allocation2 + $0x10] sm:$0xff] (!%p364_p2)  ;;  %v233_v41 = vld [vmem:[#allocation2 + $0x18] sm:$0xff] (!%p364_p2) }
   0xa   :  { %v107_v1 = vld [vmem:[%s520_s9 + $0x10] sm:$0xff]  ;;  %v105_v2 = vld [vmem:[%s520_s9] sm:$0xff]  ;;  %v108_v4 = vld [vmem:[%s520_s9 + $0x18] sm:$0xff] }
   0xb   :  { %129 = vperm.xlu1 %438, %v107_v1   ;;  %123 = vperm.xlu0 %437, %v105_v2   ;;  %v106_v5 = vld [vmem:[%s520_s9 + $0x8] sm:$0xff]  ;;  %v109_v7 = vld [vmem:[%s520_s9 + $0x20] sm:$0xff]  ;;  %v112_v8 = vld [vmem:[%s520_s9 + $0x38] sm:$0xff] }
   0xc   :  { %v110_v6 = vld [vmem:[%s520_s9 + $0x28] sm:$0xff]  ;;  %v111_v9 = vld [vmem:[%s520_s9 + $0x30] sm:$0xff]  ;;  %v113_v11 = vld [vmem:[%s520_s9 + $0x40] sm:$0xff] }
   0xd   :  { %v114_v10 = vld [vmem:[%s520_s9 + $0x48] sm:$0xff]  ;;  %v116_v12 = vld [vmem:[%s520_s9 + $0x58] sm:$0xff]  ;;  %v115_v13 = vld [vmem:[%s520_s9 + $0x50] sm:$0xff] }
   0xe   :  { %v118_v14 = vld [vmem:[%s520_s9 + $0x68] sm:$0xff]  ;;  %v117_v15 = vld [vmem:[%s520_s9 + $0x60] sm:$0xff]  ;;  %v120_v16 = vld [vmem:[%s520_s9 + $0x78] sm:$0xff] }
   0xf   :  { %132 = vperm.xlu1 %438, %v108_v4   ;;  %126 = vperm.xlu0 %437, %v106_v5   ;;  %v119_v17 = vld [vmem:[%s520_s9 + $0x70] sm:$0xff] }
  0x13   :  { %138 = vperm.xlu1 %438, %v110_v6   ;;  %135 = vperm.xlu0 %437, %v109_v7  }
  0x17   :  { %144 = vperm.xlu1 %438, %v112_v8   ;;  %141 = vperm.xlu0 %437, %v111_v9  }
  0x1b   :  { %150 = vperm.xlu1 %438, %v114_v10   ;;  %147 = vperm.xlu0 %437, %v113_v11  }
  0x1f   :  { %156 = vperm.xlu1 %438, %v116_v12   ;;  %153 = vperm.xlu0 %437, %v115_v13  }
  0x23   :  { %162 = vperm.xlu1 %438, %v118_v14   ;;  %159 = vperm.xlu0 %437, %v117_v15  }
  0x27   :  { %168 = vperm.xlu1 %438, %v120_v16   ;;  %165 = vperm.xlu0 %437, %v119_v17  }
  0x8a   :  { %v130_v19 = vpop.permute.xlu1 %129  ;;  %v124_v20 = vpop.permute.xlu0 %123 }
  0x8b   :  { %vm176_vm1 = vcmp.eq.s32.totalorder %v130_v19, %v365_v21  ;;  %vm174_vm2 = vcmp.eq.s32.totalorder %v124_v20, %v365_v21 }
  0x8e   :  { %v133_v22 = vpop.permute.xlu1 %132  ;;  %v127_v23 = vpop.permute.xlu0 %126 }
  0x8f   :  { %vm175_vm0 = vcmp.eq.s32.totalorder %v127_v23, %v365_v21  ;;  %vm177_vm3 = vcmp.eq.s32.totalorder %v133_v22, %v365_v21 }
  0x90   :  { %vm384_vm4 = vmpackc.low %vm175_vm0, %vm174_vm2 }
  0x91   :  { %411 = vmatprep.subr.msk.bf16.mxu0 %vm384_vm4, %v467_v24  ;;  %vm386_vm5 = vmpackc.low %vm177_vm3, %vm176_vm1 }
  0x92   :  { %v139_v25 = vpop.permute.xlu1 %138  ;;  %v136_v26 = vpop.permute.xlu0 %135  ;;  %412 = vmatpush3.bf16.msk.msra.mxu0 %vm384_vm4, %v467_v24 }
  0x93   :  { %vm179_vm6 = vcmp.eq.s32.totalorder %v139_v25, %v365_v21  ;;  %vm178_vm7 = vcmp.eq.s32.totalorder %v136_v26, %v365_v21  ;;  %413 = vmatprep.subr.msk.bf16.mxu0 %vm386_vm5, %v467_v24 }
  0x94   :  { %vm388_vm8 = vmpackc.low %vm179_vm6, %vm178_vm7 }
  0x96   :  { %v145_v27 = vpop.permute.xlu1 %144  ;;  %v142_v28 = vpop.permute.xlu0 %141  ;;  %414 = vmatpush3.bf16.msk.msra.mxu0 %vm386_vm5, %v467_v24 }
  0x97   :  { %vm181_vm9 = vcmp.eq.s32.totalorder %v145_v27, %v365_v21  ;;  %vm180_vm10 = vcmp.eq.s32.totalorder %v142_v28, %v365_v21  ;;  %415 = vmatprep.subr.msk.bf16.mxu0 %vm388_vm8, %v467_v24 }
  0x98   :  { %vm390_vm11 = vmpackc.low %vm181_vm9, %vm180_vm10 }
  0x9a   :  { %v151_v29 = vpop.permute.xlu1 %150  ;;  %v148_v30 = vpop.permute.xlu0 %147  ;;  %416 = vmatpush3.bf16.msk.msra.mxu0 %vm388_vm8, %v467_v24 }
  0x9b   :  { %vm183_vm12 = vcmp.eq.s32.totalorder %v151_v29, %v365_v21  ;;  %vm182_vm13 = vcmp.eq.s32.totalorder %v148_v30, %v365_v21  ;;  %417 = vmatprep.subr.msk.bf16.mxu0 %vm390_vm11, %v467_v24 }
  0x9c   :  { %vm392_vm14 = vmpackc.low %vm183_vm12, %vm182_vm13 }
  0x9e   :  { %v157_v31 = vpop.permute.xlu1 %156  ;;  %v154_v32 = vpop.permute.xlu0 %153  ;;  %418 = vmatpush3.bf16.msk.msra.mxu0 %vm390_vm11, %v467_v24 }
  0x9f   :  { %vm185_vm15 = vcmp.eq.s32.totalorder %v157_v31, %v365_v21  ;;  %vm184_vm0 = vcmp.eq.s32.totalorder %v154_v32, %v365_v21  ;;  %419 = vmatprep.subr.msk.bf16.mxu0 %vm392_vm14, %v467_v24 }
  0xa0   :  { %vm394_vm1 = vmpackc.low %vm185_vm15, %vm184_vm0 }
  0xa2   :  { %v163_v33 = vpop.permute.xlu1 %162  ;;  %v160_v34 = vpop.permute.xlu0 %159  ;;  %420 = vmatpush3.bf16.msk.msra.mxu0 %vm392_vm14, %v467_v24 }
  0xa3   :  { %vm187_vm2 = vcmp.eq.s32.totalorder %v163_v33, %v365_v21  ;;  %vm186_vm3 = vcmp.eq.s32.totalorder %v160_v34, %v365_v21  ;;  %421 = vmatprep.subr.msk.bf16.mxu0 %vm394_vm1, %v467_v24 }
  0xa4   :  { %vm396_vm4 = vmpackc.low %vm187_vm2, %vm186_vm3 }
  0xa6   :  { %v169_v35 = vpop.permute.xlu1 %168  ;;  %v166_v36 = vpop.permute.xlu0 %165  ;;  %422 = vmatpush3.bf16.msk.msra.mxu0 %vm394_vm1, %v467_v24 }
  0xa7   :  { %vm189_vm5 = vcmp.eq.s32.totalorder %v169_v35, %v365_v21  ;;  %vm188_vm6 = vcmp.eq.s32.totalorder %v166_v36, %v365_v21  ;;  %423 = vmatprep.subr.msk.bf16.mxu0 %vm396_vm4, %v467_v24 }
  0xa8   :  { %vm398_vm7 = vmpackc.low %vm189_vm5, %vm188_vm6 }
  0xaa   :  { %424 = vmatpush3.bf16.msk.msra.mxu0 %vm396_vm4, %v467_v24 }
  0xab   :  { %425 = vmatprep.subr.msk.bf16.mxu0 %vm398_vm7, %v467_v24 }
  0xae   :  { %426 = vmatpush3.bf16.msk.msra.mxu0 %vm398_vm7, %v467_v24 }
  0xb1   :  { %428 = vmatmul.mubr.bf16.vlgmr.msra.gmra.mrb[0].mxu0 %v440_v37 }
 0x184   :  { %v429_v40 = vpop.f32.mrb[0].mxu0 }
 0x185   :  { %v301_v42 = vadd.f32 %v429_v40, %v232_v38  ;;  %v284_v43 = vpop.f32.mrb[1].mxu0 }
 0x186   :  { %v299_v45 = vadd.f32 %v284_v43, %v230_v39  ;;  %v430_v46 = vpop.f32.mrb[2].mxu0 }
 0x187   :  { %305 = vst [vmem:[#allocation2 + $0x10] sm:$0xff] %v301_v42  ;;  %v302_v47 = vadd.f32 %v430_v46, %v233_v41  ;;  %v287_v48 = vpop.f32.mrb[3].mxu0 }
 0x188   :  { %303 = vst [vmem:[#allocation2] sm:$0xff] %v299_v45  ;;  %v300_v49 = vadd.f32 %v287_v48, %v231_v44 }
 0x189   :  { %306 = vst [vmem:[#allocation2 + $0x18] sm:$0xff] %v302_v47 }
 0x18a   :  { %304 = vst [vmem:[#allocation2 + $0x8] sm:$0xff] %v300_v49 }
 0x18b PF:  { %v400_v51 = vld [vmem:[%s566_s5] ss:$0 sm:$0xff]  ;;  %s468_s4 = smov [#allocation6]  }
 0x18c   :  { %s334_s12 = sshll.u32 %s468_s4, 4  ;;  %s335_s12 = int_to_ptr.vmem [resolvable:$true] %s334_s12 }
 0x18d   :  { %s441_s13 = scalar_lea.vmem %s335_s12, 512  ;;  %p446_p4 = scmp.lt.s32.totalorder %s335_s12, %s335_s12 }
 0x18e   :  { %v312_v55 = vld [vmem:[#allocation2 + $0x10] sm:$0xff]  ;;  %p442_p3 = scmp.ne.s32.totalorder %s335_s12, %s441_s13  ;;  %p447_p5 = scmp.lt.s32.totalorder %s441_s13, %s441_s13 }
 0x18f   :  { %v310_v50 = vld [vmem:[#allocation2] sm:$0xff]  ;;  %v323_v57 = vmul.f32 %v400_v51, %v312_v55 }
 0x190   :  { %v321_v53 = vmul.f32 %v400_v51, %v310_v50  ;;  %v313_v56 = vld [vmem:[#allocation2 + $0x18] sm:$0xff]  ;;  %p448_p6 = por %p447_p5, %p446_p4 }
 0x191   :  { %v311_v52 = vld [vmem:[#allocation2 + $0x8] sm:$0xff]  ;;  %v324_v58 = vmul.f32 %v400_v51, %v313_v56  ;;  %327 = vst [vmem:[#allocation6 + $0x10] sm:$0xff] %v323_v57 }
 0x192   :  { %v322_v54 = vmul.f32 %v400_v51, %v311_v52  ;;  %325 = vst [vmem:[#allocation6] sm:$0xff] %v321_v53  ;;  %p449_p7 = pnand %p448_p6, %p442_p3 }
 0x193   :  { %328 = vst [vmem:[#allocation6 + $0x18] sm:$0xff] %v324_v58 }
 0x194   :  { %326 = vst [vmem:[#allocation6 + $0x8] sm:$0xff] %v322_v54 }
 0x195   :  { %452 = shalt.err (!%p449_p7)
}
 0x196   :  { %s453_s15 = scalar_lea.hbm %s567_s6, 512 }
 0x197   :  { %p454_p8 = scmp.ne.s32.totalorder %s567_s6, %s453_s15  ;;  %p457_p9 = scmp.lt.u32.totalorder %s453_s15, %s567_s6 }
 0x199   :  { %p459_p10 = pnand %p457_p9, %p454_p8 }
 0x19b   :  { %462 = shalt.err (!%p459_p10)
}
 0x19c   :  { %s469_s20 = smov 128   ;;  %s470_s21 = smov 8  }
 0x19d   :  { %340 = dma.vmem_to_hbm [thread:$0]  %s335_s12, 512, %s567_s6, [#allocation7], %s469_s20, %s469_s20, %s470_s21  }
 0x19e   :  { %463 = dma.done.wait [#allocation7], 512  }
 0x19f   :  { %464 = vsyncadd [#allocation7], 4294966784 }
 0x1a0   :  { %344 = vsyncpa [#allocation7], 1 }

</bundles_post_ra>
